<compile_context>
chip_gen: v5e
topology: v5e:2x2
jax: 0.10.0
libtpu: 0.0.40
codegen_flags: <defaults>
</compile_context>

<pallas_src>
import jax
import jax.numpy as jnp
from jax.experimental import pallas as pl
from jax.experimental.pallas import tpu as pltpu


# ----------------------------------------------------------------------------
# Kernel: all three projections for one (batch, feature-strip) grid point.
# ----------------------------------------------------------------------------
def _fused_projector_kernel(x_ref, y_ref, z_ref, w_ref, b_ref, o_ref):
    # x_ref/y_ref/z_ref: (S, K) activation tiles (batch dim squeezed)
    # w_ref:             (3, K, tn) bf16, pre-transposed weights
    # b_ref:             (3, 1, tn) f32 biases
    # o_ref:             (3*S, tn)  concatenated output slab for this strip
    s = x_ref.shape[0]
    for p, a_ref in enumerate((x_ref, y_ref, z_ref)):
        acc = jnp.dot(a_ref[...].astype(jnp.bfloat16), w_ref[p],
                      preferred_element_type=jnp.float32)   # bf16 MXU, f32 acc
        o_ref[p * s:(p + 1) * s, :] = (acc + b_ref[p]).astype(o_ref.dtype)


# ----------------------------------------------------------------------------
# Tiling helper
# ----------------------------------------------------------------------------
def _pick_tile(dim, target, align):
    """Largest tile <= target that divides `dim` and is a multiple of `align`;
    falls back to the full dim (always a legal Pallas block)."""
    if dim <= target:
        return dim
    t = (target // align) * align
    while t >= align:
        if dim % t == 0:
            return t
        t -= align
    return dim


# ----------------------------------------------------------------------------
# Parameter handling
# ----------------------------------------------------------------------------
def init_linear_params(key, in_channels, out_channels, dtype=jnp.float32):
    """Deterministic nn.Linear-style init: W (out, in), b (out,)."""
    kw, kb = jax.random.split(key)
    bound = 1.0 / (in_channels ** 0.5)
    w = jax.random.uniform(kw, (out_channels, in_channels), dtype,
                           minval=-bound, maxval=bound)
    b = jax.random.uniform(kb, (out_channels,), dtype,
                           minval=-bound, maxval=bound)
    return w, b


def pack_projector_params(params, weight_dtype=jnp.bfloat16):
    """One-time packing (NOT per forward): stack + pre-transpose the three
    nn.Linear weights to bf16 (3, C_in, C_out); biases to f32 (3, 1, C_out)."""
    (w1, b1), (w2, b2), (w3, b3) = params
    w_s = jnp.stack([w1.T, w2.T, w3.T], axis=0).astype(weight_dtype)
    b_s = jnp.stack([b1.reshape(1, -1), b2.reshape(1, -1),
                     b3.reshape(1, -1)], axis=0).astype(jnp.float32)
    return w_s, b_s


# ----------------------------------------------------------------------------
# Forward
# ----------------------------------------------------------------------------
def linear_projector_forward(packed_params, x, y, z, *, tn_target=512):
    """packed_params = pack_projector_params(...); x, y, z: (B, S, C_in).
    Returns (B, 3*S, C_out) == cat([proj1(x), proj2(y), proj3(z)], dim=1)."""
    w_s, b_s = packed_params                 # (3, K, N) bf16, (3, 1, N) f32
    B, S, K = x.shape
    assert y.shape == x.shape and z.shape == x.shape
    assert w_s.shape[1] == K
    N = w_s.shape[-1]
    out_dtype = x.dtype

    tn = _pick_tile(N, tn_target, 128)       # lane-dense output strip
    assert N % tn == 0
    grid = (B, N // tn)                      # n innermost: activations stay
                                             # VMEM-resident, weights stream.

    # Scoped-VMEM budget from the actual (double-buffered) footprint; raised
    # above the 16 MiB v5e default but kept far below v7x's 64 MiB physical.
    est = 2 * (3 * S * K * x.dtype.itemsize          # x, y, z tiles
               + 3 * K * tn * w_s.dtype.itemsize     # weight strip
               + 3 * tn * b_s.dtype.itemsize         # bias strip
               + 3 * S * tn * jnp.dtype(out_dtype).itemsize)  # output slab
    vmem_limit = min(max(32 * 1024 * 1024, int(est * 1.5)), 96 * 1024 * 1024)

    return pl.pallas_call(
        _fused_projector_kernel,
        out_shape=jax.ShapeDtypeStruct((B, 3 * S, N), out_dtype),
        grid_spec=pltpu.PrefetchScalarGridSpec(
            num_scalar_prefetch=0,
            grid=grid,
            in_specs=[
                # activations (B, S, K): block index independent of n ->
                # fetched once per batch item, resident across the n sweep.
                pl.BlockSpec((None, S, K), lambda b, n: (b, 0, 0)),
                pl.BlockSpec((None, S, K), lambda b, n: (b, 0, 0)),
                pl.BlockSpec((None, S, K), lambda b, n: (b, 0, 0)),
                # stacked bf16 weights (3, K, N): one (3, K, tn) strip per n.
                pl.BlockSpec((3, K, tn), lambda b, n: (0, 0, n)),
                # stacked f32 biases (3, 1, N).
                pl.BlockSpec((3, 1, tn), lambda b, n: (0, 0, n)),
            ],
            # Concatenated output (B, 3*S, N): the kernel writes all three
            # projections into their slots of this slab -> no jnp.concatenate.
            out_specs=pl.BlockSpec((None, 3 * S, tn), lambda b, n: (b, 0, n)),
        ),
        compiler_params=pltpu.CompilerParams(
            dimension_semantics=("parallel", "parallel"),
            vmem_limit_bytes=vmem_limit),
    )(x, y, z, w_s, b_s)


# ----------------------------------------------------------------------------
# Self-test
# ----------------------------------------------------------------------------
if __name__ == "__main__":
    key = jax.random.PRNGKey(0)
    k1, k2, k3, kx, ky, kz = jax.random.split(key, 6)

    # Small but lane-dense shapes (C_in/C_out multiples of 128).
    B, S, C_in, C_out = 2, 8, 256, 256

    raw_params = (
        init_linear_params(k1, C_in, C_out),
        init_linear_params(k2, C_in, C_out),
        init_linear_params(k3, C_in, C_out),
    )
    # Pack once, outside the per-step hot path (bf16 weights, f32 bias).
    packed = pack_projector_params(raw_params)

    x = jax.random.normal(kx, (B, S, C_in), jnp.float32)
    y = jax.random.normal(ky, (B, S, C_in), jnp.float32)
    z = jax.random.normal(kz, (B, S, C_in), jnp.float32)

    out = linear_projector_forward(packed, x, y, z)
    out = jax.block_until_ready(out)

    # Reference with the SAME bf16-quantized params (isolates kernel math;
    # the bf16 weight cast is the intentional quantization from packing).
    def ref(packed, x, y, z):
        w_s, b_s = packed
        w = w_s.astype(jnp.float32)
        outs = []
        for p, a in enumerate((x, y, z)):
            a16 = a.astype(jnp.bfloat16).astype(jnp.float32)
            outs.append(a16 @ w[p] + b_s[p])
        return jnp.concatenate(outs, axis=1)

    expected = ref(packed, x, y, z)
    assert out.shape == (B, 3 * S, C_out), out.shape
    assert jnp.allclose(out, expected, atol=1e-2, rtol=1e-2), \
        float(jnp.max(jnp.abs(out - expected)))

    print("KERNEL_OK")
</pallas_src>

<mosaic_0001>
module attributes {stable_mosaic.version = 11 : i64} {
  func.func @_fused_projector_kernel(%arg0: i32, %arg1: i32, %arg2: memref<1x8x256xf32, #tpu.memory_space<vmem>>, %arg3: memref<1x8x256xf32, #tpu.memory_space<vmem>>, %arg4: memref<1x8x256xf32, #tpu.memory_space<vmem>>, %arg5: memref<3x256x256xbf16, #tpu.memory_space<vmem>>, %arg6: memref<3x1x256xf32, #tpu.memory_space<vmem>>, %arg7: memref<1x24x256xf32, #tpu.memory_space<vmem>>) attributes {dimension_semantics = [#tpu.dimension_semantics<parallel>, #tpu.dimension_semantics<parallel>], iteration_bounds = array<i64: 2, 1>, scalar_prefetch = 0 : i64, scratch_operands = 0 : i64, tpu.core_type = #tpu.core_type<tc>, window_params = [{transform_indices = @transform_0, window_bounds = array<i64: 1, 8, 256>}, {transform_indices = @transform_1, window_bounds = array<i64: 1, 8, 256>}, {transform_indices = @transform_2, window_bounds = array<i64: 1, 8, 256>}, {transform_indices = @transform_3, window_bounds = array<i64: 3, 256, 256>}, {transform_indices = @transform_4, window_bounds = array<i64: 3, 1, 256>}, {transform_indices = @transform_5, window_bounds = array<i64: 1, 24, 256>}]} {
    %c0 = arith.constant 0 : index
    %c0_0 = arith.constant 0 : index
    %c0_1 = arith.constant 0 : index
    %0 = vector.load %arg2[%c0, %c0_0, %c0_1] : memref<1x8x256xf32, #tpu.memory_space<vmem>>, vector<1x8x256xf32>
    %1 = vector.shape_cast %0 : vector<1x8x256xf32> to vector<8x256xf32>
    %2 = arith.truncf %1 : vector<8x256xf32> to vector<8x256xbf16>
    %c0_2 = arith.constant 0 : index
    %c0_3 = arith.constant 0 : index
    %c0_4 = arith.constant 0 : index
    %3 = vector.load %arg5[%c0_2, %c0_3, %c0_4] : memref<3x256x256xbf16, #tpu.memory_space<vmem>>, vector<1x256x256xbf16>
    %4 = vector.shape_cast %3 : vector<1x256x256xbf16> to vector<256x256xbf16>
    %cst = arith.constant dense<0.000000e+00> : vector<8x256xf32>
    %5 = tpu.matmul %2, %4, %cst {dimension_numbers = #tpu.dot_dimension_numbers<[1], [0], [0], [1], [0, 0, 1, 1], [], []>} : vector<8x256xbf16>, vector<256x256xbf16>, vector<8x256xf32> -> vector<8x256xf32>
    %c0_5 = arith.constant 0 : index
    %c0_6 = arith.constant 0 : index
    %c0_7 = arith.constant 0 : index
    %6 = vector.load %arg6[%c0_5, %c0_6, %c0_7] : memref<3x1x256xf32, #tpu.memory_space<vmem>>, vector<1x1x256xf32>
    %7 = vector.shape_cast %6 : vector<1x1x256xf32> to vector<1x256xf32>
    %8 = vector.broadcast %7 : vector<1x256xf32> to vector<8x256xf32>
    %9 = arith.addf %5, %8 : vector<8x256xf32>
    %c0_8 = arith.constant 0 : index
    %c0_9 = arith.constant 0 : index
    %c0_10 = arith.constant 0 : index
    %10 = vector.load %arg7[%c0_8, %c0_9, %c0_10] : memref<1x24x256xf32, #tpu.memory_space<vmem>>, vector<1x8x256xf32>
    %11 = vector.shape_cast %10 : vector<1x8x256xf32> to vector<8x256xf32>
    %12 = vector.shape_cast %9 : vector<8x256xf32> to vector<1x8x256xf32>
    tpu.vector_store %arg7[%c0_8, %c0_9, %c0_10], %12 {strides = array<i32>} : memref<1x24x256xf32, #tpu.memory_space<vmem>>, vector<1x8x256xf32>,
    %c0_11 = arith.constant 0 : index
    %c0_12 = arith.constant 0 : index
    %c0_13 = arith.constant 0 : index
    %13 = vector.load %arg3[%c0_11, %c0_12, %c0_13] : memref<1x8x256xf32, #tpu.memory_space<vmem>>, vector<1x8x256xf32>
    %14 = vector.shape_cast %13 : vector<1x8x256xf32> to vector<8x256xf32>
    %15 = arith.truncf %14 : vector<8x256xf32> to vector<8x256xbf16>
    %c1 = arith.constant 1 : index
    %c0_14 = arith.constant 0 : index
    %c0_15 = arith.constant 0 : index
    %16 = vector.load %arg5[%c1, %c0_14, %c0_15] : memref<3x256x256xbf16, #tpu.memory_space<vmem>>, vector<1x256x256xbf16>
    %17 = vector.shape_cast %16 : vector<1x256x256xbf16> to vector<256x256xbf16>
    %cst_16 = arith.constant dense<0.000000e+00> : vector<8x256xf32>
    %18 = tpu.matmul %15, %17, %cst_16 {dimension_numbers = #tpu.dot_dimension_numbers<[1], [0], [0], [1], [0, 0, 1, 1], [], []>} : vector<8x256xbf16>, vector<256x256xbf16>, vector<8x256xf32> -> vector<8x256xf32>
    %c1_17 = arith.constant 1 : index
    %c0_18 = arith.constant 0 : index
    %c0_19 = arith.constant 0 : index
    %19 = vector.load %arg6[%c1_17, %c0_18, %c0_19] : memref<3x1x256xf32, #tpu.memory_space<vmem>>, vector<1x1x256xf32>
    %20 = vector.shape_cast %19 : vector<1x1x256xf32> to vector<1x256xf32>
    %21 = vector.broadcast %20 : vector<1x256xf32> to vector<8x256xf32>
    %22 = arith.addf %18, %21 : vector<8x256xf32>
    %c0_20 = arith.constant 0 : index
    %c8 = arith.constant 8 : index
    %c0_21 = arith.constant 0 : index
    %23 = vector.load %arg7[%c0_20, %c8, %c0_21] : memref<1x24x256xf32, #tpu.memory_space<vmem>>, vector<1x8x256xf32>
    %24 = vector.shape_cast %23 : vector<1x8x256xf32> to vector<8x256xf32>
    %25 = vector.shape_cast %22 : vector<8x256xf32> to vector<1x8x256xf32>
    tpu.vector_store %arg7[%c0_20, %c8, %c0_21], %25 {strides = array<i32>} : memref<1x24x256xf32, #tpu.memory_space<vmem>>, vector<1x8x256xf32>,
    %c0_22 = arith.constant 0 : index
    %c0_23 = arith.constant 0 : index
    %c0_24 = arith.constant 0 : index
    %26 = vector.load %arg4[%c0_22, %c0_23, %c0_24] : memref<1x8x256xf32, #tpu.memory_space<vmem>>, vector<1x8x256xf32>
    %27 = vector.shape_cast %26 : vector<1x8x256xf32> to vector<8x256xf32>
    %28 = arith.truncf %27 : vector<8x256xf32> to vector<8x256xbf16>
    %c2 = arith.constant 2 : index
    %c0_25 = arith.constant 0 : index
    %c0_26 = arith.constant 0 : index
    %29 = vector.load %arg5[%c2, %c0_25, %c0_26] : memref<3x256x256xbf16, #tpu.memory_space<vmem>>, vector<1x256x256xbf16>
    %30 = vector.shape_cast %29 : vector<1x256x256xbf16> to vector<256x256xbf16>
    %cst_27 = arith.constant dense<0.000000e+00> : vector<8x256xf32>
    %31 = tpu.matmul %28, %30, %cst_27 {dimension_numbers = #tpu.dot_dimension_numbers<[1], [0], [0], [1], [0, 0, 1, 1], [], []>} : vector<8x256xbf16>, vector<256x256xbf16>, vector<8x256xf32> -> vector<8x256xf32>
    %c2_28 = arith.constant 2 : index
    %c0_29 = arith.constant 0 : index
    %c0_30 = arith.constant 0 : index
    %32 = vector.load %arg6[%c2_28, %c0_29, %c0_30] : memref<3x1x256xf32, #tpu.memory_space<vmem>>, vector<1x1x256xf32>
    %33 = vector.shape_cast %32 : vector<1x1x256xf32> to vector<1x256xf32>
    %34 = vector.broadcast %33 : vector<1x256xf32> to vector<8x256xf32>
    %35 = arith.addf %31, %34 : vector<8x256xf32>
    %c0_31 = arith.constant 0 : index
    %c16 = arith.constant 16 : index
    %c0_32 = arith.constant 0 : index
    %36 = vector.load %arg7[%c0_31, %c16, %c0_32] : memref<1x24x256xf32, #tpu.memory_space<vmem>>, vector<1x8x256xf32>
    %37 = vector.shape_cast %36 : vector<1x8x256xf32> to vector<8x256xf32>
    %38 = vector.shape_cast %35 : vector<8x256xf32> to vector<1x8x256xf32>
    tpu.vector_store %arg7[%c0_31, %c16, %c0_32], %38 {strides = array<i32>} : memref<1x24x256xf32, #tpu.memory_space<vmem>>, vector<1x8x256xf32>,
    return
  }
  func.func @transform_0(%arg0: i32, %arg1: i32) -> (i32, i32, i32) {
    %c0_i32 = arith.constant 0 : i32
    %c0_i32_0 = arith.constant 0 : i32
    %c0_i32_1 = arith.constant 0 : i32
    return %arg0, %c0_i32, %c0_i32_0 : i32, i32, i32
  }
  func.func @transform_1(%arg0: i32, %arg1: i32) -> (i32, i32, i32) {
    %c0_i32 = arith.constant 0 : i32
    %c0_i32_0 = arith.constant 0 : i32
    %c0_i32_1 = arith.constant 0 : i32
    return %arg0, %c0_i32, %c0_i32_0 : i32, i32, i32
  }
  func.func @transform_2(%arg0: i32, %arg1: i32) -> (i32, i32, i32) {
    %c0_i32 = arith.constant 0 : i32
    %c0_i32_0 = arith.constant 0 : i32
    %c0_i32_1 = arith.constant 0 : i32
    return %arg0, %c0_i32, %c0_i32_0 : i32, i32, i32
  }
  func.func @transform_3(%arg0: i32, %arg1: i32) -> (i32, i32, i32) {
    %c0_i32 = arith.constant 0 : i32
    %c0_i32_0 = arith.constant 0 : i32
    %c0_i32_1 = arith.constant 0 : i32
    return %c0_i32, %c0_i32_0, %arg1 : i32, i32, i32
  }
  func.func @transform_4(%arg0: i32, %arg1: i32) -> (i32, i32, i32) {
    %c0_i32 = arith.constant 0 : i32
    %c0_i32_0 = arith.constant 0 : i32
    %c0_i32_1 = arith.constant 0 : i32
    return %c0_i32, %c0_i32_0, %arg1 : i32, i32, i32
  }
  func.func @transform_5(%arg0: i32, %arg1: i32) -> (i32, i32, i32) {
    %c0_i32 = arith.constant 0 : i32
    %c0_i32_0 = arith.constant 0 : i32
    return %arg0, %c0_i32, %arg1 : i32, i32, i32
  }
}

</mosaic_0001>

<bundles_post_ra>
// kernel: tpu_custom_call.1
= control target key start
LH: loop header
LB: loop body
LE: loop exit
PB: predicated region body
PF: predicated region fallthrough
CT: control target
= control target key end

     0   :  { %s2421_s0 = inlined_call_operand.hbm [shape: f32[2,8,256], index: 0, kind: input, shape index: {}]   ;;  %s2422_s1 = inlined_call_operand.hbm [shape: f32[2,8,256], index: 1, kind: input, shape index: {}]   ;;  %s2423_s2 = inlined_call_operand.hbm [shape: f32[2,8,256], index: 2, kind: input, shape index: {}]   ;;  %s2424_s3 = inlined_call_operand.hbm [shape: bf16[3,256,256], index: 3, kind: input, shape index: {}]   ;;  %s2425_s4 = inlined_call_operand.hbm [shape: f32[3,1,256], index: 4, kind: input, shape index: {}]   ;;  %s2426_s5 = inlined_call_operand.hbm [shape: f32[2,24,256], index: 5, kind: output, shape index: {}]  }
   0x1   :  { %2434 = sst [smem:[#allocation23_spill]] %s2422_s1 }
   0x2   :  { %2435 = sst [smem:[#allocation24_spill]] %s2424_s3 }
   0x3   :  { %2436 = sst [smem:[#allocation25_spill]] %s2425_s4 }
   0x4   :  { %10 = vsyncpa [#allocation3], 0 }
   0x5   :  { %12 = vsyncpa [#allocation3 + $0x1], 0 }
   0x6   :  { %13 = vsyncpa [#allocation6], 0 }
   0x7   :  { %15 = vsyncpa [#allocation6 + $0x1], 0 }
   0x8   :  { %16 = vsyncpa [#allocation9], 0 }
   0x9   :  { %17 = vsyncpa [#allocation4], 0 }
   0xa   :  { %19 = vsyncpa [#allocation4 + $0x1], 0  ;;  %s2213_s18 = smov 0   ;;  %s2215_s19 = smov 0  }
   0xb   :  { %s2217_s20 = smov 0   ;;  %s2219_s21 = smov 0  }
   0xc   :  { %s2221_s22 = smov 0   ;;  %s2223_s23 = smov 0  }
   0xd LB: > { %2437 = sst [smem:[#allocation16_spill]] %s2153_s18  ;;  %s2244_s24 = sadd.s32 4294967295, %s2173_s23   ;;  %s2173_s23 = sphi %s2223_s23, %s25_s23   ;;  %s2169_s22 = sphi %s2221_s22, %s2461_s22   ;;  %s2165_s21 = sphi %s2219_s21, %s2460_s21   ;;  %s2161_s20 = sphi %s2217_s20, %s2459_s20   ;;  %s2157_s19 = sphi %s2215_s19, %s2463_s19   ;;  %s2153_s18 = sphi %s2213_s18, %s2462_s18  }
   0xe   : > { %2438 = sst [smem:[#allocation17_spill]] %s2161_s20  ;;  %p1327_p0 = scmp.ge.s32.totalorder %s2173_s23, 1 }
   0xf   : > { %2439 = sst [smem:[#allocation18_spill]] %s2169_s22  ;;  %p58_p1 = scmp.eq.s32.totalorder %s2244_s24, 0 }
  0x10   : > { %2440 = sst [smem:[#allocation19_spill]] %s2173_s23  ;;  %p200_p2 = scmp.lt.s32.totalorder %s2173_s23, 3 }
  0x11   : > { %s2441_s3 = sld [smem:[#allocation24_spill]]  ;;  %s2175_s29 = smov [#allocation8]  }
  0x12   : > { %p2252_p3 = pnand %p1327_p0, %p200_p2  ;;  %s216_s30 = sshll.u32 %s2175_s29, 4  ;;  %s217_s30 = int_to_ptr.vmem [resolvable:$true] %s216_s30 }
  0x13   : > { %s2176_s7 = smov 128   ;;  %s2177_s8 = smov 8  }
  0x14   : > { %p1850_p4 = pneg %p2252_p3  ;;  %s1326_s9 = sadd.s32 4294967294, %s2173_s23  }
  0x15   : > { %s37_s10 = sadd.s32 1, %s2169_s22  ;;  %s44_s11 = sadd.s32 1, %s2161_s20 }
  0x16   : > { %p2260_p5 = pnand %p1850_p4, %p58_p1  ;;  %p39_p7 = scmp.ge.s32.totalorder %s37_s10, 2 }
  0x17   : > { %s214_s27 = sshll.u32 %s2441_s3, 4  ;;  %p51_p8 = scmp.ne.s32.totalorder %s2161_s20, %s2157_s19  ;;  %s215_s27 = int_to_ptr.hbm [resolvable:$true] %s214_s27 }
  0x18   : > { %1853 = dma.hbm_to_vmem [thread:$0]  (!%p2260_p5), %s215_s27, 12288, %s217_s30, [#allocation9], %s2176_s7, %s2176_s7, %s2177_s8  }
  0x19   : > { %p52_p9 = scmp.eq.s32.totalorder %s2173_s23, 0  ;;  %p57_p10 = scmp.ne.s32.totalorder %s2157_s19, %s2153_s18 }
  0x1a   : > { %s2465_s10 = smov (%p39_p7, %s37_s10), 0  ;;  %p187_p13 = scmp.eq.s32.totalorder %s2244_s24, 1 }
  0x1b   : > { %2444 = sst [smem:[#allocation20_spill]] %s2465_s10  ;;  %p2277_p11 = por %p52_p9, %p51_p8 }
  0x1c   : > { %p2283_p12 = por %p58_p1, %p57_p10  ;;  %s41_s14 = ssub.s32 %s2169_s22, %s2465_s10 }
  0x1d   : > { %p42_p0 = scmp.eq.s32.totalorder %s41_s14, 0  ;;  %p193_p2 = scmp.eq.s32.totalorder %s1326_s9, 1 }
  0x1e   : > { %p2290_p4 = por %p187_p13, %p51_p8  ;;  %p1873_p7 = scmp.lt.s32.totalorder %s2173_s23, 2 }
  0x1f   : > { %s2296_s16 = scalar_select %p42_p0, %s2161_s20, %s44_s11  }
  0x20   : > { %p2298_p9 = por %p193_p2, %p57_p10  ;;  %s246_s25 = sand.u32 1, %s2161_s20  }
  0x21   : > { %2448 = sst [smem:[#allocation21_spill]] %s2296_s16  ;;  %s2303_s26 = sshll.u32 %s246_s25, 4 }
  0x22   : > { %s2449_s17 = scalar_select %p2298_p9, 1, 0 }
  0x23   : > { %s1733_s27 = sshll.u32 %s2169_s22, 4  ;;  %p2308_p6 = pnand %p1873_p7, %p2277_p11 }
  0x24   : > { %2450 = sst [smem:[#allocation22_spill]] %s2449_s17  ;;  %s266_s30 = sand.u32 1, %s2173_s23  }
  0x25   : > { %s2452_s1 = sld [smem:[#allocation23_spill]]  ;;  %s270_s14 = scalar_lea.vmem [#allocation5], %s2303_s26 }
  0x26   : > { %s279_s3 = sshll.u32 %s270_s14, 4  ;;  %s267_s10 = scalar_lea.sflag [#allocation6], %s266_s30  ;;  %s280_s3 = int_to_ptr.vmem [resolvable:$true] %s279_s3 }
  0x27   : > { %s2453_s4 = sld [smem:[#allocation25_spill]]  ;;  %s2178_s20 = smov [#allocation10]  }
  0x28   : > { %s232_s7 = sshll.u32 %s2178_s20, 4  ;;  %s2179_s8 = smov 32   ;;  %s233_s7 = int_to_ptr.vmem [resolvable:$true] %s232_s7 }
  0x29   : > { %s255_s30 = scalar_lea.hbm %s2421_s0, %s1733_s27  ;;  %s247_s22 = scalar_lea.sflag [#allocation3], %s246_s25 }
  0x2a   : > { %s290_s6 = scalar_lea.vmem [#allocation7], %s2303_s26 }
  0x2b   : > { %s275_s9 = scalar_lea.hbm %s2452_s1, %s1733_s27  ;;  %s299_s18 = sshll.u32 %s290_s6, 4  ;;  %s300_s18 = int_to_ptr.vmem [resolvable:$true] %s299_s18 }
  0x2c   : > { %s277_s11 = sshll.u32 %s275_s9, 4  ;;  %s2180_s9 = smov 2   ;;  %s278_s11 = int_to_ptr.hbm [resolvable:$true] %s277_s11 }
  0x2d   : > { %1863 = dma.hbm_to_vmem [thread:$0]  (!%p2308_p6), %s278_s11, 256, %s280_s3, %s267_s10  }
  0x2e   : > { %s230_s16 = sshll.u32 %s2453_s4, 4  ;;  %s257_s3 = sshll.u32 %s255_s30, 4  ;;  %s231_s16 = int_to_ptr.hbm [resolvable:$true] %s230_s16  ;;  %s258_s3 = int_to_ptr.hbm [resolvable:$true] %s257_s3 }
  0x2f   : > { %1856 = dma.hbm_to_vmem [thread:$0]  (!%p2260_p5), %s231_s16, 96, %s233_s7, [#allocation9], %s2179_s8, %s2179_s8, %s2180_s9  }
  0x30   : > { %s250_s11 = scalar_lea.vmem [#allocation2], %s2303_s26  ;;  %s295_s4 = scalar_lea.hbm %s2423_s2, %s1733_s27 }
  0x31   : > { %s259_s23 = sshll.u32 %s250_s11, 4  ;;  %s297_s17 = sshll.u32 %s295_s4, 4  ;;  %s260_s23 = int_to_ptr.vmem [resolvable:$true] %s259_s23  ;;  %s298_s17 = int_to_ptr.hbm [resolvable:$true] %s297_s17 }
  0x32   : > { %1860 = dma.hbm_to_vmem [thread:$0]  (!%p2308_p6), %s258_s3, 256, %s260_s23, %s247_s22  }
  0x33   : > { %1866 = dma.hbm_to_vmem [thread:$0]  (!%p2308_p6), %s298_s17, 256, %s300_s18, %s267_s10  }
  0x34   : > { %308 = sbr.rel (%p2252_p3) target bundleno = 304 (0x130), region = 40  ;;  %s2339_s1 = sand.u32 (!%p2252_p3), 1, %s2157_s19  }
  0x35   : > { %s2342_s23 = sshll.u32 (!%p2252_p3), %s2339_s1, 4  ;;  %s311_s16 = scalar_lea.sflag (!%p2252_p3), [#allocation3], %s2339_s1 }
  0x36   : > { %s314_s4 = scalar_lea.vmem (!%p2252_p3), [#allocation2], %s2342_s23 }
  0x39   : > { %2136 = dma.done.wait (%p2283_p12), %s311_s16, 256  }
  0x3a   : > { %2138 = vsyncadd (%p2283_p12), %s311_s16, 4294967040  ;;  %s320_s18 = sand.u32 1, %s2244_s24   ;;  %s324_s10 = scalar_lea.vmem [#allocation5], %s2342_s23 }
  0x3b   : > { %s321_s28 = scalar_lea.sflag [#allocation6], %s320_s18 }
  0x3c   : > { %2140 = dma.done.wait (%p2283_p12), %s321_s28, 512  }
  0x3d   : > { %2142 = vsyncadd (%p2283_p12), %s321_s28, 4294966784  ;;  %s334_s17 = scalar_lea.vmem [#allocation7], %s2342_s23 }
  0x3e   : > { %2144 = dma.done.wait (%p58_p1), [#allocation9], 12384  }
  0x3f   : > { %2146 = vsyncadd (%p58_p1), [#allocation9], 4294954912  ;;  %v1404_v0 = vld [vmem:[#allocation8 + $0x70] sm:$0xf]  ;;  %v1751_v1 = vld [vmem:[#allocation8 + $0x74] sm:$0xf0] }
  0x40   : > { %v1468_v2 = vld [vmem:[#allocation8 + $0xf0] sm:$0xf]  ;;  %v1405_v3 = vor.u32 %v1751_v1, %v1404_v0  ;;  %v1767_v4 = vld [vmem:[#allocation8 + $0xf4] sm:$0xf0]  ;;  %v1750_v5 = vld [vmem:[#allocation8 + $0x74] sm:$0xf] }
  0x41   : > { %v1406_v6 = vld [vmem:[#allocation8 + $0x78] sm:$0xf0]  ;;  %v1469_v7 = vor.u32 %v1767_v4, %v1468_v2  ;;  %v1766_v9 = vld [vmem:[#allocation8 + $0xf4] sm:$0xf]  ;;  %v1396_v11 = vld [vmem:[#allocation8 + $0x60] sm:$0xf] }
  0x42   : > { %v1409_v8 = vor.u32 %v1750_v5, %v1406_v6  ;;  %v1470_v10 = vld [vmem:[#allocation8 + $0xf8] sm:$0xf0]  ;;  %587 = vmatpush.bf16.msra.mxu0 %v1405_v3  ;;  %v1749_v13 = vld [vmem:[#allocation8 + $0x64] sm:$0xf0]  ;;  %v1460_v14 = vld [vmem:[#allocation8 + $0xe0] sm:$0xf] }
  0x43   : > { %v1473_v12 = vor.u32 %v1766_v9, %v1470_v10  ;;  %v1765_v15 = vld [vmem:[#allocation8 + $0xe4] sm:$0xf0]  ;;  %600 = vmatpush.bf16.msra.mxu1 %v1469_v7  ;;  %v1397_v16 = vor.u32 %v1749_v13, %v1396_v11  ;;  %v1748_v18 = vld [vmem:[#allocation8 + $0x64] sm:$0xf]  ;;  %v1398_v19 = vld [vmem:[#allocation8 + $0x68] sm:$0xf0] }
  0x44   : > { %613 = vmatpush.bf16.msra.mxu2 %v1409_v8  ;;  %v1461_v17 = vor.u32 %v1765_v15, %v1460_v14  ;;  %v1764_v20 = vld [vmem:[#allocation8 + $0xe4] sm:$0xf]  ;;  %v1401_v21 = vor.u32 %v1748_v18, %v1398_v19  ;;  %v1462_v22 = vld [vmem:[#allocation8 + $0xe8] sm:$0xf0]  ;;  %v1388_v23 = vld [vmem:[#allocation8 + $0x50] sm:$0xf] }
  0x45   : > { %626 = vmatpush.bf16.msra.mxu3 %v1473_v12  ;;  %v1747_v24 = vld [vmem:[#allocation8 + $0x54] sm:$0xf0]  ;;  %v1465_v25 = vor.u32 %v1764_v20, %v1462_v22  ;;  %v1452_v26 = vld [vmem:[#allocation8 + $0xd0] sm:$0xf]  ;;  %v1746_v28 = vld [vmem:[#allocation8 + $0x54] sm:$0xf] }
  0x46   : > { %v1763_v27 = vld [vmem:[#allocation8 + $0xd4] sm:$0xf0]  ;;  %588 = vmatpush.bf16.msra.mxu0 %v1397_v16  ;;  %v1389_v29 = vor.u32 %v1747_v24, %v1388_v23  ;;  %v1390_v30 = vld [vmem:[#allocation8 + $0x58] sm:$0xf0]  ;;  %v1762_v31 = vld [vmem:[#allocation8 + $0xd4] sm:$0xf] }
  0x47   : > { %v1454_v32 = vld [vmem:[#allocation8 + $0xd8] sm:$0xf0]  ;;  %601 = vmatpush.bf16.msra.mxu1 %v1461_v17  ;;  %v1453_v33 = vor.u32 %v1763_v27, %v1452_v26  ;;  %v1393_v34 = vor.u32 %v1746_v28, %v1390_v30  ;;  %v1380_v35 = vld [vmem:[#allocation8 + $0x40] sm:$0xf]  ;;  %v1745_v36 = vld [vmem:[#allocation8 + $0x44] sm:$0xf0] }
  0x48   : > { %614 = vmatpush.bf16.msra.mxu2 %v1401_v21  ;;  %v1444_v37 = vld [vmem:[#allocation8 + $0xc0] sm:$0xf]  ;;  %v1457_v38 = vor.u32 %v1762_v31, %v1454_v32  ;;  %v1761_v39 = vld [vmem:[#allocation8 + $0xc4] sm:$0xf0]  ;;  %v1744_v40 = vld [vmem:[#allocation8 + $0x44] sm:$0xf]  ;;  %v1381_v44 = vor.u32 %v1745_v36, %v1380_v35 }
  0x49   : > { %627 = vmatpush.bf16.msra.mxu3 %v1465_v25  ;;  %v1382_v41 = vld [vmem:[#allocation8 + $0x48] sm:$0xf0]  ;;  %v1760_v42 = vld [vmem:[#allocation8 + $0xc4] sm:$0xf]  ;;  %v1445_v45 = vor.u32 %v1761_v39, %v1444_v37  ;;  %v1372_v47 = vld [vmem:[#allocation8 + $0x30] sm:$0xf] }
  0x4a   : > { %v1446_v43 = vld [vmem:[#allocation8 + $0xc8] sm:$0xf0]  ;;  %589 = vmatpush.bf16.msra.mxu0 %v1389_v29  ;;  %v1385_v46 = vor.u32 %v1744_v40, %v1382_v41  ;;  %v1743_v48 = vld [vmem:[#allocation8 + $0x34] sm:$0xf0]  ;;  %v1436_v49 = vld [vmem:[#allocation8 + $0xb0] sm:$0xf] }
  0x4b   : > { %602 = vmatpush.bf16.msra.mxu1 %v1453_v33  ;;  %v1449_v50 = vor.u32 %v1760_v42, %v1446_v43  ;;  %v1759_v51 = vld [vmem:[#allocation8 + $0xb4] sm:$0xf0]  ;;  %v1742_v52 = vld [vmem:[#allocation8 + $0x34] sm:$0xf]  ;;  %v1374_v53 = vld [vmem:[#allocation8 + $0x38] sm:$0xf0]  ;;  %v1373_v56 = vor.u32 %v1743_v48, %v1372_v47 }
  0x4c   : > { %615 = vmatpush.bf16.msra.mxu2 %v1393_v34  ;;  %v1758_v54 = vld [vmem:[#allocation8 + $0xb4] sm:$0xf]  ;;  %v1438_v55 = vld [vmem:[#allocation8 + $0xb8] sm:$0xf0]  ;;  %v1437_v57 = vor.u32 %v1759_v51, %v1436_v49  ;;  %v1377_v58 = vor.u32 %v1742_v52, %v1374_v53  ;;  %v1364_v59 = vld [vmem:[#allocation8 + $0x20] sm:$0xf] }
  0x4d   : > { %628 = vmatpush.bf16.msra.mxu3 %v1457_v38  ;;  %v1741_v60 = vld [vmem:[#allocation8 + $0x24] sm:$0xf0]  ;;  %v1428_v61 = vld [vmem:[#allocation8 + $0xa0] sm:$0xf]  ;;  %v1441_v62 = vor.u32 %v1758_v54, %v1438_v55  ;;  %v1740_v0 = vld [vmem:[#allocation8 + $0x24] sm:$0xf] }
  0x4e   : > { %590 = vmatpush.bf16.msra.mxu0 %v1381_v44  ;;  %v1757_v63 = vld [vmem:[#allocation8 + $0xa4] sm:$0xf0]  ;;  %v1366_v1 = vld [vmem:[#allocation8 + $0x28] sm:$0xf0]  ;;  %v1756_v2 = vld [vmem:[#allocation8 + $0xa4] sm:$0xf]  ;;  %v1365_v4 = vor.u32 %v1741_v60, %v1364_v59 }
  0x4f   : > { %603 = vmatpush.bf16.msra.mxu1 %v1445_v45  ;;  %v1430_v3 = vld [vmem:[#allocation8 + $0xa8] sm:$0xf0]  ;;  %v1429_v5 = vor.u32 %v1757_v63, %v1428_v61  ;;  %v1369_v6 = vor.u32 %v1740_v0, %v1366_v1  ;;  %v1356_v7 = vld [vmem:[#allocation8 + $0x10] sm:$0xf]  ;;  %v1739_v8 = vld [vmem:[#allocation8 + $0x14] sm:$0xf0] }
  0x50   : > { %616 = vmatpush.bf16.msra.mxu2 %v1385_v46  ;;  %v1420_v9 = vld [vmem:[#allocation8 + $0x90] sm:$0xf]  ;;  %v1433_v10 = vor.u32 %v1756_v2, %v1430_v3  ;;  %v1755_v11 = vld [vmem:[#allocation8 + $0x94] sm:$0xf0]  ;;  %v1738_v12 = vld [vmem:[#allocation8 + $0x14] sm:$0xf]  ;;  %v1357_v16 = vor.u32 %v1739_v8, %v1356_v7 }
  0x51   : > { %629 = vmatpush.bf16.msra.mxu3 %v1449_v50  ;;  %v1358_v13 = vld [vmem:[#allocation8 + $0x18] sm:$0xf0]  ;;  %v1754_v14 = vld [vmem:[#allocation8 + $0x94] sm:$0xf]  ;;  %v1348_v17 = vld [vmem:[#allocation8] sm:$0xf]  ;;  %v1421_v19 = vor.u32 %v1755_v11, %v1420_v9 }
  0x52   : > { %591 = vmatpush.bf16.msra.mxu0 %v1373_v56  ;;  %v1422_v15 = vld [vmem:[#allocation8 + $0x98] sm:$0xf0]  ;;  %v1737_v18 = vld [vmem:[#allocation8 + $0x4] sm:$0xf0]  ;;  %v1361_v20 = vor.u32 %v1738_v12, %v1358_v13  ;;  %v1412_v21 = vld [vmem:[#allocation8 + $0x80] sm:$0xf] }
  0x53   : > { %604 = vmatpush.bf16.msra.mxu1 %v1437_v57  ;;  %v1753_v22 = vld [vmem:[#allocation8 + $0x84] sm:$0xf0]  ;;  %v1736_v23 = vld [vmem:[#allocation8 + $0x4] sm:$0xf]  ;;  %v1425_v24 = vor.u32 %v1754_v14, %v1422_v15  ;;  %v1350_v25 = vld [vmem:[#allocation8 + $0x8] sm:$0xf0]  ;;  %v1349_v31 = vor.u32 %v1737_v18, %v1348_v17 }
  0x54   : > { %617 = vmatpush.bf16.msra.mxu2 %v1377_v58  ;;  %v1752_v26 = vld [vmem:[#allocation8 + $0x84] sm:$0xf]  ;;  %v1414_v27 = vld [vmem:[#allocation8 + $0x88] sm:$0xf0]  ;;  %v1532_v28 = vld [vmem:[#allocation8 + $0x170] sm:$0xf]  ;;  %v1413_v35 = vor.u32 %v1753_v22, %v1412_v21  ;;  %v1353_v36 = vor.u32 %v1736_v23, %v1350_v25 }
  0x55   : > { %630 = vmatpush.bf16.msra.mxu3 %v1441_v62  ;;  %v1783_v29 = vld [vmem:[#allocation8 + $0x174] sm:$0xf0]  ;;  %v1596_v30 = vld [vmem:[#allocation8 + $0x1f0] sm:$0xf]  ;;  %v1782_v33 = vld [vmem:[#allocation8 + $0x174] sm:$0xf]  ;;  %v1417_v39 = vor.u32 %v1752_v26, %v1414_v27 }
  0x56   : > { %592 = vmatpush.bf16.msra.mxu0 %v1365_v4  ;;  %v1799_v32 = vld [vmem:[#allocation8 + $0x1f4] sm:$0xf0]  ;;  %v1534_v34 = vld [vmem:[#allocation8 + $0x178] sm:$0xf0]  ;;  %v1798_v37 = vld [vmem:[#allocation8 + $0x1f4] sm:$0xf]  ;;  %v1533_v40 = vor.u32 %v1783_v29, %v1532_v28 }
  0x57   : > { %605 = vmatpush.bf16.msra.mxu1 %v1429_v5  ;;  %v1598_v38 = vld [vmem:[#allocation8 + $0x1f8] sm:$0xf0]  ;;  %v1597_v41 = vor.u32 %v1799_v32, %v1596_v30  ;;  %v1537_v42 = vor.u32 %v1782_v33, %v1534_v34  ;;  %v1524_v43 = vld [vmem:[#allocation8 + $0x160] sm:$0xf]  ;;  %v1781_v44 = vld [vmem:[#allocation8 + $0x164] sm:$0xf0] }
  0x58   : > { %618 = vmatpush.bf16.msra.mxu2 %v1369_v6  ;;  %v1588_v45 = vld [vmem:[#allocation8 + $0x1e0] sm:$0xf]  ;;  %v1601_v46 = vor.u32 %v1798_v37, %v1598_v38  ;;  %v1797_v47 = vld [vmem:[#allocation8 + $0x1e4] sm:$0xf0]  ;;  %v1780_v48 = vld [vmem:[#allocation8 + $0x164] sm:$0xf]  ;;  %v1525_v52 = vor.u32 %v1781_v44, %v1524_v43 }
  0x59   : > { %631 = vmatpush.bf16.msra.mxu3 %v1433_v10  ;;  %v1526_v49 = vld [vmem:[#allocation8 + $0x168] sm:$0xf0]  ;;  %v1796_v50 = vld [vmem:[#allocation8 + $0x1e4] sm:$0xf]  ;;  %v1516_v53 = vld [vmem:[#allocation8 + $0x150] sm:$0xf]  ;;  %v1589_v55 = vor.u32 %v1797_v47, %v1588_v45 }
  0x5a   : > { %593 = vmatpush.bf16.msra.mxu0 %v1357_v16  ;;  %v1590_v51 = vld [vmem:[#allocation8 + $0x1e8] sm:$0xf0]  ;;  %v1779_v54 = vld [vmem:[#allocation8 + $0x154] sm:$0xf0]  ;;  %v1529_v56 = vor.u32 %v1780_v48, %v1526_v49  ;;  %v1580_v57 = vld [vmem:[#allocation8 + $0x1d0] sm:$0xf] }
  0x5b   : > { %606 = vmatpush.bf16.msra.mxu1 %v1421_v19  ;;  %v1795_v58 = vld [vmem:[#allocation8 + $0x1d4] sm:$0xf0]  ;;  %v385_v59 = vld [vmem:[%s314_s4] sm:$0xff]  ;;  %v1593_v60 = vor.u32 %v1796_v50, %v1590_v51  ;;  %v1518_v62 = vld [vmem:[#allocation8 + $0x158] sm:$0xf0]  ;;  %v1517_v4 = vor.u32 %v1779_v54, %v1516_v53  ;;  %s1832_s24 = smul.u32 48, %s2339_s1 }
  0x5c   : > { %619 = vmatpush.bf16.msra.mxu2 %v1361_v20  ;;  %v1778_v61 = vld [vmem:[#allocation8 + $0x154] sm:$0xf]  ;;  %v387_v63 = vpack.c.bf16 %v385_v59, %v385_v59  ;;  %v386_v0 = vld [vmem:[%s314_s4 + $0x8] sm:$0xff]  ;;  %v1581_v5 = vor.u32 %v1795_v58, %v1580_v57  ;;  %v1508_v7 = vld [vmem:[#allocation8 + $0x140] sm:$0xf]  ;;  %s1833_s25 = smul.u32 48, %s2165_s21 }
  0x5d   : > { %632 = vmatpush.bf16.msra.mxu3 %v1425_v24  ;;  %v1794_v1 = vld [vmem:[#allocation8 + $0x1d4] sm:$0xf]  ;;  %v1582_v2 = vld [vmem:[#allocation8 + $0x1d8] sm:$0xf0]  ;;  %v388_v3 = vpack.c.bf16 %v386_v0, %v386_v0  ;;  %v1521_v6 = vor.u32 %v1778_v61, %v1518_v62  ;;  %v1777_v8 = vld [vmem:[#allocation8 + $0x144] sm:$0xf0] }
  0x5e   : > { %594 = vmatpush.bf16.msra.mxu0 %v1349_v31  ;;  %v1572_v9 = vld [vmem:[#allocation8 + $0x1c0] sm:$0xf]  ;;  %v1585_v10 = vor.u32 %v1794_v1, %v1582_v2  ;;  %v1793_v11 = vld [vmem:[#allocation8 + $0x1c4] sm:$0xf0]  ;;  %v1776_v12 = vld [vmem:[#allocation8 + $0x144] sm:$0xf]  ;;  %v1509_v16 = vor.u32 %v1777_v8, %v1508_v7  ;;  %s1171_s29 = scalar_lea.hbm %s2426_s5, %s1833_s25 }
  0x5f   : > { %607 = vmatpush.bf16.msra.mxu1 %v1413_v35  ;;  %v1510_v13 = vld [vmem:[#allocation8 + $0x148] sm:$0xf0]  ;;  %v1792_v14 = vld [vmem:[#allocation8 + $0x1c4] sm:$0xf]  ;;  %v1573_v17 = vor.u32 %v1793_v11, %v1572_v9  ;;  %v1500_v19 = vld [vmem:[#allocation8 + $0x130] sm:$0xf] }
  0x60   : > { %620 = vmatpush.bf16.msra.mxu2 %v1353_v36  ;;  %v1574_v15 = vld [vmem:[#allocation8 + $0x1c8] sm:$0xf0]  ;;  %v1513_v18 = vor.u32 %v1776_v12, %v1510_v13  ;;  %v1775_v20 = vld [vmem:[#allocation8 + $0x134] sm:$0xf0]  ;;  %v1564_v21 = vld [vmem:[#allocation8 + $0x1b0] sm:$0xf] }
  0x61   : > { %633 = vmatpush.bf16.msra.mxu3 %v1417_v39  ;;  %595 = vmatmul.bf16.vlgmr.msra.gmra.mxu0 %v387_v63  ;;  %v1577_v22 = vor.u32 %v1792_v14, %v1574_v15  ;;  %v1791_v23 = vld [vmem:[#allocation8 + $0x1b4] sm:$0xf0]  ;;  %v1774_v24 = vld [vmem:[#allocation8 + $0x134] sm:$0xf]  ;;  %v1502_v25 = vld [vmem:[#allocation8 + $0x138] sm:$0xf0]  ;;  %v1501_v28 = vor.u32 %v1775_v20, %v1500_v19 }
  0x62   : > { %845 = vmatpush.bf16.msrb.mxu0 %v1533_v40  ;;  %608 = vmatmul.bf16.vlgmr.msra.gmra.mxu1 %v388_v3  ;;  %v1790_v26 = vld [vmem:[#allocation8 + $0x1b4] sm:$0xf]  ;;  %v1566_v27 = vld [vmem:[#allocation8 + $0x1b8] sm:$0xf0]  ;;  %v1565_v29 = vor.u32 %v1791_v23, %v1564_v21  ;;  %v1505_v30 = vor.u32 %v1774_v24, %v1502_v25  ;;  %v1492_v31 = vld [vmem:[#allocation8 + $0x120] sm:$0xf] }
  0x63   : > { %858 = vmatpush.bf16.msrb.mxu1 %v1597_v41  ;;  %621 = vmatmul.bf16.vlgmr.msra.gmra.mxu2 %v387_v63  ;;  %v1773_v32 = vld [vmem:[#allocation8 + $0x124] sm:$0xf0]  ;;  %v1556_v33 = vld [vmem:[#allocation8 + $0x1a0] sm:$0xf]  ;;  %v1569_v34 = vor.u32 %v1790_v26, %v1566_v27  ;;  %v1772_v36 = vld [vmem:[#allocation8 + $0x124] sm:$0xf] }
  0x64   : > { %871 = vmatpush.bf16.msrb.mxu2 %v1537_v42  ;;  %634 = vmatmul.bf16.vlgmr.msra.gmra.mxu3 %v388_v3  ;;  %v1789_v35 = vld [vmem:[#allocation8 + $0x1a4] sm:$0xf0]  ;;  %v1494_v37 = vld [vmem:[#allocation8 + $0x128] sm:$0xf0]  ;;  %v1788_v38 = vld [vmem:[#allocation8 + $0x1a4] sm:$0xf]  ;;  %v1493_v40 = vor.u32 %v1773_v32, %v1492_v31 }
  0x65   : > { %884 = vmatpush.bf16.msrb.mxu3 %v1601_v46  ;;  %v1558_v39 = vld [vmem:[#allocation8 + $0x1a8] sm:$0xf0]  ;;  %v1557_v41 = vor.u32 %v1789_v35, %v1556_v33  ;;  %v1497_v42 = vor.u32 %v1772_v36, %v1494_v37  ;;  %v1484_v43 = vld [vmem:[#allocation8 + $0x110] sm:$0xf]  ;;  %v1771_v44 = vld [vmem:[#allocation8 + $0x114] sm:$0xf0] }
  0x66   : > { %846 = vmatpush.bf16.msrb.mxu0 %v1525_v52  ;;  %v1548_v45 = vld [vmem:[#allocation8 + $0x190] sm:$0xf]  ;;  %v1561_v46 = vor.u32 %v1788_v38, %v1558_v39  ;;  %v1787_v47 = vld [vmem:[#allocation8 + $0x194] sm:$0xf0]  ;;  %v1770_v48 = vld [vmem:[#allocation8 + $0x114] sm:$0xf]  ;;  %v1485_v52 = vor.u32 %v1771_v44, %v1484_v43 }
  0x67   : > { %859 = vmatpush.bf16.msrb.mxu1 %v1589_v55  ;;  %v1486_v49 = vld [vmem:[#allocation8 + $0x118] sm:$0xf0]  ;;  %v1786_v50 = vld [vmem:[#allocation8 + $0x194] sm:$0xf]  ;;  %v1476_v53 = vld [vmem:[#allocation8 + $0x100] sm:$0xf]  ;;  %v1549_v55 = vor.u32 %v1787_v47, %v1548_v45 }
  0x68   : > { %872 = vmatpush.bf16.msrb.mxu2 %v1529_v56  ;;  %v1550_v51 = vld [vmem:[#allocation8 + $0x198] sm:$0xf0]  ;;  %v1769_v54 = vld [vmem:[#allocation8 + $0x104] sm:$0xf0]  ;;  %v1489_v56 = vor.u32 %v1770_v48, %v1486_v49  ;;  %v1540_v57 = vld [vmem:[#allocation8 + $0x180] sm:$0xf] }
  0x69   : > { %885 = vmatpush.bf16.msrb.mxu3 %v1593_v60  ;;  %v1785_v58 = vld [vmem:[#allocation8 + $0x184] sm:$0xf0]  ;;  %v1768_v59 = vld [vmem:[#allocation8 + $0x104] sm:$0xf]  ;;  %v1553_v60 = vor.u32 %v1786_v50, %v1550_v51  ;;  %v1478_v61 = vld [vmem:[#allocation8 + $0x108] sm:$0xf0]  ;;  %v1477_v3 = vor.u32 %v1769_v54, %v1476_v53 }
  0x6a   : > { %847 = vmatpush.bf16.msrb.mxu0 %v1517_v4  ;;  %v1784_v62 = vld [vmem:[#allocation8 + $0x184] sm:$0xf]  ;;  %v1542_v63 = vld [vmem:[#allocation8 + $0x188] sm:$0xf0]  ;;  %v1660_v0 = vld [vmem:[#allocation8 + $0x270] sm:$0xf]  ;;  %v1541_v7 = vor.u32 %v1785_v58, %v1540_v57  ;;  %v1481_v8 = vor.u32 %v1768_v59, %v1478_v61 }
  0x6b   : > { %860 = vmatpush.bf16.msrb.mxu1 %v1581_v5  ;;  %v1815_v1 = vld [vmem:[#allocation8 + $0x274] sm:$0xf0]  ;;  %v1724_v2 = vld [vmem:[#allocation8 + $0x2f0] sm:$0xf]  ;;  %v1814_v5 = vld [vmem:[#allocation8 + $0x274] sm:$0xf]  ;;  %v1545_v12 = vor.u32 %v1784_v62, %v1542_v63 }
  0x6c   : > { %873 = vmatpush.bf16.msrb.mxu2 %v1521_v6  ;;  %v1831_v4 = vld [vmem:[#allocation8 + $0x2f4] sm:$0xf0]  ;;  %v1662_v6 = vld [vmem:[#allocation8 + $0x278] sm:$0xf0]  ;;  %v1830_v9 = vld [vmem:[#allocation8 + $0x2f4] sm:$0xf]  ;;  %v1661_v13 = vor.u32 %v1815_v1, %v1660_v0 }
  0x6d   : > { %886 = vmatpush.bf16.msrb.mxu3 %v1585_v10  ;;  %v1726_v10 = vld [vmem:[#allocation8 + $0x2f8] sm:$0xf0]  ;;  %v641_v11 = vld [vmem:[%s324_s10] sm:$0xff]  ;;  %v1725_v15 = vor.u32 %v1831_v4, %v1724_v2  ;;  %v1829_v21 = vld [vmem:[#allocation8 + $0x2e4] sm:$0xf0]  ;;  %s2374_s13 = scalar_lea.vmem [#allocation11], %s1832_s24 }
  0x6e   : > { %848 = vmatpush.bf16.msrb.mxu0 %v1509_v16  ;;  %v642_v14 = vld [vmem:[%s324_s10 + $0x8] sm:$0xff]  ;;  %v1665_v16 = vor.u32 %v1814_v5, %v1662_v6  ;;  %v1716_v19 = vld [vmem:[#allocation8 + $0x2e0] sm:$0xf]  ;;  %v1729_v20 = vor.u32 %v1830_v9, %v1726_v10  ;;  %v643_v24 = vpack.c.bf16 %v641_v11, %v641_v11  ;;  %v1828_v25 = vld [vmem:[#allocation8 + $0x2e4] sm:$0xf]  ;;  %s1172_s7 = sshll.u32 %s2374_s13, 4  ;;  %s1173_s7 = int_to_ptr.vmem [resolvable:$true] %s1172_s7 }
  0x6f   : > { %861 = vmatpush.bf16.msrb.mxu1 %v1573_v17  ;;  %v1652_v17 = vld [vmem:[#allocation8 + $0x260] sm:$0xf]  ;;  %v1654_v23 = vld [vmem:[#allocation8 + $0x268] sm:$0xf0]  ;;  %v644_v27 = vpack.c.bf16 %v642_v14, %v642_v14  ;;  %v1644_v31 = vld [vmem:[#allocation8 + $0x250] sm:$0xf] }
  0x70   : > { %874 = vmatpush.bf16.msrb.mxu2 %v1513_v18  ;;  %v1813_v18 = vld [vmem:[#allocation8 + $0x264] sm:$0xf0]  ;;  %v1718_v26 = vld [vmem:[#allocation8 + $0x2e8] sm:$0xf0]  ;;  %v1811_v32 = vld [vmem:[#allocation8 + $0x254] sm:$0xf0] }
  0x71   : > { %887 = vmatpush.bf16.msrb.mxu3 %v1577_v22  ;;  %v1812_v22 = vld [vmem:[#allocation8 + $0x264] sm:$0xf]  ;;  %v1708_v33 = vld [vmem:[#allocation8 + $0x2d0] sm:$0xf]  ;;  %v1827_v35 = vld [vmem:[#allocation8 + $0x2d4] sm:$0xf0] }
  0x72   : > { %849 = vmatpush.bf16.msrb.mxu0 %v1501_v28  ;;  %v1653_v28 = vor.u32 %v1813_v18, %v1652_v17  ;;  %v1810_v36 = vld [vmem:[#allocation8 + $0x254] sm:$0xf]  ;;  %v1646_v37 = vld [vmem:[#allocation8 + $0x258] sm:$0xf0]  ;;  %v1636_v43 = vld [vmem:[#allocation8 + $0x240] sm:$0xf] }
  0x73   : > { %862 = vmatpush.bf16.msrb.mxu1 %v1565_v29  ;;  %v1717_v29 = vor.u32 %v1829_v21, %v1716_v19  ;;  %v1826_v38 = vld [vmem:[#allocation8 + $0x2d4] sm:$0xf]  ;;  %v1710_v39 = vld [vmem:[#allocation8 + $0x2d8] sm:$0xf0]  ;;  %v1809_v44 = vld [vmem:[#allocation8 + $0x244] sm:$0xf0] }
  0x74   : > { %875 = vmatpush.bf16.msrb.mxu2 %v1505_v30  ;;  %v1657_v30 = vor.u32 %v1812_v22, %v1654_v23  ;;  %v1700_v45 = vld [vmem:[#allocation8 + $0x2c0] sm:$0xf]  ;;  %v1825_v47 = vld [vmem:[#allocation8 + $0x2c4] sm:$0xf0]  ;;  %v1808_v48 = vld [vmem:[#allocation8 + $0x244] sm:$0xf] }
  0x75   : > { %888 = vmatpush.bf16.msrb.mxu3 %v1569_v34  ;;  %v1721_v34 = vor.u32 %v1828_v25, %v1718_v26  ;;  %v1638_v49 = vld [vmem:[#allocation8 + $0x248] sm:$0xf0]  ;;  %v1824_v50 = vld [vmem:[#allocation8 + $0x2c4] sm:$0xf]  ;;  %v1701_v53 = vor.u32 %v1825_v47, %v1700_v45  ;;  %v1692_v57 = vld [vmem:[#allocation8 + $0x2b0] sm:$0xf] }
  0x76   : > { %850 = vmatpush.bf16.msrb.mxu0 %v1493_v40  ;;  %v1645_v40 = vor.u32 %v1811_v32, %v1644_v31  ;;  %v1702_v51 = vld [vmem:[#allocation8 + $0x2c8] sm:$0xf0]  ;;  %v1641_v54 = vor.u32 %v1808_v48, %v1638_v49  ;;  %v1823_v59 = vld [vmem:[#allocation8 + $0x2b4] sm:$0xf0]  ;;  %v1630_v61 = vld [vmem:[#allocation8 + $0x238] sm:$0xf0] }
  0x77   : > { %863 = vmatpush.bf16.msrb.mxu1 %v1557_v41  ;;  %v1709_v41 = vor.u32 %v1827_v35, %v1708_v33  ;;  %v1705_v58 = vor.u32 %v1824_v50, %v1702_v51  ;;  %v1822_v62 = vld [vmem:[#allocation8 + $0x2b4] sm:$0xf]  ;;  %v1694_v63 = vld [vmem:[#allocation8 + $0x2b8] sm:$0xf0]  ;;  %v1693_v1 = vor.u32 %v1823_v59, %v1692_v57  ;;  %v1805_v4 = vld [vmem:[#allocation8 + $0x224] sm:$0xf0] }
  0x78   : > { %876 = vmatpush.bf16.msrb.mxu2 %v1497_v42  ;;  %v1649_v42 = vor.u32 %v1810_v36, %v1646_v37  ;;  %v1684_v5 = vld [vmem:[#allocation8 + $0x2a0] sm:$0xf]  ;;  %v1697_v6 = vor.u32 %v1822_v62, %v1694_v63  ;;  %v1622_v9 = vld [vmem:[#allocation8 + $0x228] sm:$0xf0]  ;;  %v1820_v10 = vld [vmem:[#allocation8 + $0x2a4] sm:$0xf] }
  0x79   : > { %889 = vmatpush.bf16.msrb.mxu3 %v1561_v46  ;;  %v1713_v46 = vor.u32 %v1826_v38, %v1710_v39  ;;  %v1686_v11 = vld [vmem:[#allocation8 + $0x2a8] sm:$0xf0]  ;;  %v1676_v17 = vld [vmem:[#allocation8 + $0x290] sm:$0xf]  ;;  %v1819_v19 = vld [vmem:[#allocation8 + $0x294] sm:$0xf0] }
  0x7a   : > { %851 = vmatpush.bf16.msrb.mxu0 %v1485_v52  ;;  %v1637_v52 = vor.u32 %v1809_v44, %v1636_v43  ;;  %v1689_v18 = vor.u32 %v1820_v10, %v1686_v11  ;;  %v1614_v21 = vld [vmem:[#allocation8 + $0x218] sm:$0xf0]  ;;  %v1818_v22 = vld [vmem:[#allocation8 + $0x294] sm:$0xf]  ;;  %v1677_v25 = vor.u32 %v1819_v19, %v1676_v17  ;;  %v1817_v31 = vld [vmem:[#allocation8 + $0x284] sm:$0xf0] }
  0x7b   : > { %864 = vmatpush.bf16.msrb.mxu1 %v1549_v55  ;;  %v1628_v55 = vld [vmem:[#allocation8 + $0x230] sm:$0xf]  ;;  %v1678_v23 = vld [vmem:[#allocation8 + $0x298] sm:$0xf0]  ;;  %v1800_v32 = vld [vmem:[#allocation8 + $0x204] sm:$0xf] }
  0x7c   : > { %877 = vmatpush.bf16.msrb.mxu2 %v1489_v56  ;;  %v1807_v56 = vld [vmem:[#allocation8 + $0x234] sm:$0xf0]  ;;  %v1606_v33 = vld [vmem:[#allocation8 + $0x208] sm:$0xf0]  ;;  %v899_v37 = vld [vmem:[%s334_s17] sm:$0xff]  ;;  %s1174_s8 = sshll.u32 %s1171_s29, 4  ;;  %s1175_s8 = int_to_ptr.hbm [resolvable:$true] %s1174_s8 }
  0x7d   : > { %890 = vmatpush.bf16.msrb.mxu3 %v1553_v60  ;;  %v1806_v60 = vld [vmem:[#allocation8 + $0x234] sm:$0xf]  ;;  %v1629_v0 = vor.u32 %v1807_v56, %v1628_v55  ;;  %v1670_v35 = vld [vmem:[#allocation8 + $0x288] sm:$0xf0]  ;;  %v1609_v39 = vor.u32 %v1800_v32, %v1606_v33  ;;  %v421_v44 = vld [vmem:[#allocation10] sm:$0x3] }
  0x7e   : > { %852 = vmatpush.bf16.msrb.mxu0 %v1477_v3  ;;  %v1633_v2 = vor.u32 %v1806_v60, %v1630_v61  ;;  %v1620_v3 = vld [vmem:[#allocation8 + $0x220] sm:$0xf]  ;;  %v423_v45 = vperm.slane %v421_v44, 0  ;;  %v424_v49 = vperm.slane %v421_v44, 1  ;;  %v937_v10 = vld [vmem:[#allocation10 + $0x4] sm:$0x3] }
  0x7f   : > { %865 = vmatpush.bf16.msrb.mxu1 %v1541_v7  ;;  %v1821_v7 = vld [vmem:[#allocation8 + $0x2a4] sm:$0xf0]  ;;  %v679_v59 = vld [vmem:[#allocation10 + $0x2] sm:$0x3]  ;;  %v939_v11 = vperm.slane %v937_v10, 0  ;;  %s1158_s21 = scalar_lea.sflag [#allocation4], %s2339_s1 }
  0x80   : > { %878 = vmatpush.bf16.msrb.mxu2 %v1481_v8  ;;  %v1804_v8 = vld [vmem:[#allocation8 + $0x224] sm:$0xf]  ;;  %v681_v60 = vperm.slane %v679_v59, 0  ;;  %s2097_s9 = sshra.s32 %s1175_s8, 4  ;;  %s2103_s11 = scalar_lea.hbm %s2426_s5, 96  ;;  %s2098_s9 = int_to_ptr.hbm [resolvable:$true] %s2097_s9 }
  0x81   : > { %891 = vmatpush.bf16.msrb.mxu3 %v1545_v12  ;;  %853 = vmatmul.bf16.vlgmr.msrb.gmra.mxu0 %v643_v24  ;;  %v1621_v12 = vor.u32 %v1805_v4, %v1620_v3  ;;  %v1625_v14 = vor.u32 %v1804_v8, %v1622_v9  ;;  %s2099_s14 = scalar_lea.hbm %s2098_s9, 48  ;;  %p2104_p6 = scmp.lt.s32.totalorder %s2098_s9, %s2426_s5 }
  0x82   : > { %1103 = vmatpush.bf16.msra.mxu0 %v1661_v13  ;;  %866 = vmatmul.bf16.vlgmr.msrb.gmra.mxu1 %v644_v27  ;;  %v1685_v13 = vor.u32 %v1821_v7, %v1684_v5  ;;  %p2100_p1 = scmp.ne.s32.totalorder %s2098_s9, %s2099_s14  ;;  %p2105_p8 = scmp.lt.s32.totalorder %s2103_s11, %s2099_s14 }
  0x83   : > { %1116 = vmatpush.bf16.msra.mxu1 %v1725_v15  ;;  %879 = vmatmul.bf16.vlgmr.msrb.gmra.mxu2 %v643_v24  ;;  %v1612_v15 = vld [vmem:[#allocation8 + $0x210] sm:$0xf] }
  0x84   : > { %1129 = vmatpush.bf16.msra.mxu2 %v1665_v16  ;;  %892 = vmatmul.bf16.vlgmr.msrb.gmra.mxu3 %v644_v27  ;;  %v1803_v16 = vld [vmem:[#allocation8 + $0x214] sm:$0xf0]  ;;  %v1604_v27 = vld [vmem:[#allocation8 + $0x200] sm:$0xf]  ;;  %p2101_p3 = pnand %p2100_p1, %p2290_p4  ;;  %p2106_p10 = por %p2105_p8, %p2104_p6 }
  0x85   : > { %1142 = vmatpush.bf16.msra.mxu3 %v1729_v20  ;;  %v1802_v20 = vld [vmem:[#allocation8 + $0x214] sm:$0xf]  ;;  %v1613_v24 = vor.u32 %v1803_v16, %v1612_v15  ;;  %v940_v16 = vperm.slane %v937_v10, 1 }
  0x86   : > { %1104 = vmatpush.bf16.msra.mxu0 %v1653_v28  ;;  %v1617_v26 = vor.u32 %v1802_v20, %v1614_v21  ;;  %v1801_v28 = vld [vmem:[#allocation8 + $0x204] sm:$0xf0]  ;;  %p2102_p5 = pneg %p2101_p3 }
  0x87   : > { %1117 = vmatpush.bf16.msra.mxu1 %v1717_v29  ;;  %v1668_v29 = vld [vmem:[#allocation8 + $0x280] sm:$0xf]  ;;  %v1605_v36 = vor.u32 %v1801_v28, %v1604_v27 }
  0x88   : > { %1130 = vmatpush.bf16.msra.mxu2 %v1657_v30  ;;  %v1681_v30 = vor.u32 %v1818_v22, %v1678_v23  ;;  %v1669_v38 = vor.u32 %v1817_v31, %v1668_v29  ;;  %p2107_p11 = pnand %p2106_p10, %p2102_p5 }
  0x89   : > { %1143 = vmatpush.bf16.msra.mxu3 %v1721_v34  ;;  %v1816_v34 = vld [vmem:[#allocation8 + $0x284] sm:$0xf] }
  0x8a   : > { %1105 = vmatpush.bf16.msra.mxu0 %v1645_v40  ;;  %v900_v40 = vld [vmem:[%s334_s17 + $0x8] sm:$0xff] }
  0x8b   : > { %1118 = vmatpush.bf16.msra.mxu1 %v1709_v41  ;;  %v1673_v41 = vor.u32 %v1816_v34, %v1670_v35  ;;  %v902_v43 = vpack.c.bf16 %v900_v40, %v900_v40 }
  0x8c   : > { %1131 = vmatpush.bf16.msra.mxu2 %v1649_v42  ;;  %v901_v42 = vpack.c.bf16 %v899_v37, %v899_v37 }
  0x8d   : > { %1144 = vmatpush.bf16.msra.mxu3 %v1713_v46 }
  0x8e   : > { %1106 = vmatpush.bf16.msra.mxu0 %v1637_v52 }
  0x8f   : > { %1119 = vmatpush.bf16.msra.mxu1 %v1701_v53 }
  0x90   : > { %1132 = vmatpush.bf16.msra.mxu2 %v1641_v54 }
  0x91   : > { %1145 = vmatpush.bf16.msra.mxu3 %v1705_v58 }
  0x92   : > { %1107 = vmatpush.bf16.msra.mxu0 %v1629_v0  ;;  %v682_v0 = vperm.slane %v679_v59, 1 }
  0x93   : > { %1120 = vmatpush.bf16.msra.mxu1 %v1693_v1 }
  0x94   : > { %1133 = vmatpush.bf16.msra.mxu2 %v1633_v2 }
  0x95   : > { %1146 = vmatpush.bf16.msra.mxu3 %v1697_v6 }
  0x96   : > { %1108 = vmatpush.bf16.msra.mxu0 %v1621_v12 }
  0x97   : > { %1121 = vmatpush.bf16.msra.mxu1 %v1685_v13 }
  0x98   : > { %1134 = vmatpush.bf16.msra.mxu2 %v1625_v14 }
  0x99   : > { %1147 = vmatpush.bf16.msra.mxu3 %v1689_v18 }
  0x9a   : > { %1109 = vmatpush.bf16.msra.mxu0 %v1613_v24 }
  0x9b   : > { %1122 = vmatpush.bf16.msra.mxu1 %v1677_v25 }
  0x9c   : > { %1135 = vmatpush.bf16.msra.mxu2 %v1617_v26 }
  0x9d   : > { %1148 = vmatpush.bf16.msra.mxu3 %v1681_v30 }
  0x9e   : > { %1110 = vmatpush.bf16.msra.mxu0 %v1605_v36 }
  0x9f   : > { %1123 = vmatpush.bf16.msra.mxu1 %v1669_v38 }
  0xa0   : > { %1136 = vmatpush.bf16.msra.mxu2 %v1609_v39 }
  0xa1   : > { %1149 = vmatpush.bf16.msra.mxu3 %v1673_v41  ;;  %1111 = vmatmul.bf16.vlgmr.msra.gmra.mxu0 %v901_v42 }
  0xa2   : > { %1124 = vmatmul.bf16.vlgmr.msra.gmra.mxu1 %v902_v43 }
  0xa3   : > { %1137 = vmatmul.bf16.vlgmr.msra.gmra.mxu2 %v901_v42 }
  0xa4   : > { %1150 = vmatmul.bf16.vlgmr.msra.gmra.mxu3 %v902_v43 }
  0xde   : > { %v596_v46 = vpop.f32.mrf.mxu0 }
  0xdf   : > { %v597_v47 = vadd.f32 %v596_v46, %v423_v45  ;;  %v609_v48 = vpop.f32.mrf.mxu1 }
  0xe1   : > { %v610_v50 = vadd.f32 %v609_v48, %v597_v47 }
  0xe3   : > { %639 = vst [vmem:[%s2374_s13] sm:$0xff] %v610_v50 }
  0xe6   : > { %v622_v51 = vpop.f32.mrf.mxu2  ;;  %v598_v55 = vpop.f32.mrf.mxu0 }
  0xe7   : > { %v623_v52 = vadd.f32 %v622_v51, %v424_v49  ;;  %v635_v53 = vpop.f32.mrf.mxu3  ;;  %v611_v56 = vpop.f32.mrf.mxu1 }
  0xe9   : > { %v636_v54 = vadd.f32 %v635_v53, %v623_v52 }
  0xeb   : > { %640 = vst [vmem:[%s2374_s13 + $0x8] sm:$0xff] %v636_v54 }
  0xee   : > { %v624_v57 = vpop.f32.mrf.mxu2 }
  0xef   : > { %v637_v58 = vpop.f32.mrf.mxu3 }
  0xfe   : > { %v854_v61 = vpop.f32.mrf.mxu0 }
  0xff   : > { %v855_v62 = vadd.f32 %v854_v61, %v681_v60  ;;  %v867_v63 = vpop.f32.mrf.mxu1 }
 0x101   : > { %v868_v1 = vadd.f32 %v867_v63, %v855_v62 }
 0x103   : > { %897 = vst [vmem:[%s2374_s13 + $0x10] sm:$0xff] %v868_v1 }
 0x106   : > { %v880_v2 = vpop.f32.mrf.mxu2  ;;  %v856_v6 = vpop.f32.mrf.mxu0 }
 0x107   : > { %v881_v3 = vadd.f32 %v880_v2, %v682_v0  ;;  %v893_v4 = vpop.f32.mrf.mxu3  ;;  %v869_v7 = vpop.f32.mrf.mxu1 }
 0x109   : > { %v894_v5 = vadd.f32 %v893_v4, %v881_v3 }
 0x10b   : > { %898 = vst [vmem:[%s2374_s13 + $0x18] sm:$0xff] %v894_v5 }
 0x10e   : > { %v882_v8 = vpop.f32.mrf.mxu2 }
 0x10f   : > { %v895_v9 = vpop.f32.mrf.mxu3 }
 0x11e   : > { %v1112_v12 = vpop.f32.mrf.mxu0 }
 0x11f   : > { %v1113_v13 = vadd.f32 %v1112_v12, %v939_v11  ;;  %v1125_v14 = vpop.f32.mrf.mxu1 }
 0x121   : > { %v1126_v15 = vadd.f32 %v1125_v14, %v1113_v13 }
 0x123   : > { %1155 = vst [vmem:[%s2374_s13 + $0x20] sm:$0xff] %v1126_v15 }
 0x126   : > { %v1138_v17 = vpop.f32.mrf.mxu2  ;;  %v1114_v20 = vpop.f32.mrf.mxu0 }
 0x127   : > { %v1139_v18 = vadd.f32 %v1138_v17, %v940_v16  ;;  %v1151_v19 = vpop.f32.mrf.mxu3  ;;  %v1127_v21 = vpop.f32.mrf.mxu1 }
 0x129   : > { %v1152_v22 = vadd.f32 %v1151_v19, %v1139_v18 }
 0x12b   : > { %1156 = vst [vmem:[%s2374_s13 + $0x28] sm:$0xff] %v1152_v22 }
 0x12c   : > { %2110 = shalt.err (!%p2107_p11)
}
 0x12d   : > { %s2181_s20 = smov 256   ;;  %s2182_s6 = smov 16  }
 0x12e   : > { %1848 = dma.vmem_to_hbm [thread:$0]  (%p2290_p4), %s1173_s7, 768, %s1175_s8, %s1158_s21, %s2181_s20, %s2181_s20, %s2182_s6   ;;  %v1140_v23 = vpop.f32.mrf.mxu2 }
 0x12f   : > { %v1153_v24 = vpop.f32.mrf.mxu3 }
 0x130 PF: > { %s2454_s1 = sld [smem:[#allocation16_spill]] }
 0x131   : > { %s2456_s16 = sld [smem:[#allocation19_spill]] }
 0x136   : > { %s1189_s4 = sand.u32 1, %s2454_s1  }
 0x137   : > { %p2457_p12 = scmp.ge.s32.totalorder %s2456_s16, 2  ;;  %s1190_s18 = scalar_lea.sflag [#allocation4], %s1189_s4 }
 0x139   : > { %p1868_p13 = pnand %p2457_p12, %p2298_p9 }
 0x13b   : > { %p1869_p0 = pneg %p1868_p13 }
 0x13d   : > { %2148 = dma.done.wait (%p1869_p0), %s1190_s18, 768  }
 0x13e   : > { %2150 = vsyncadd (%p1869_p0), %s1190_s18, 4294966528  ;;  %s25_s23 = sadd.s32 1, %s2456_s16   ;;  %s2458_s15 = sld [smem:[#allocation17_spill]] }
 0x13f   : > { %p22_p2 = scmp.ge.s32.totalorder %s25_s23, 4   ;;  %s2459_s20 = sld [smem:[#allocation21_spill]] }
 0x140   : > { %s2460_s21 = sld [smem:[#allocation18_spill]]  ;;  %s2462_s18 = smov %s2157_s19 }
 0x141   : > { %s2461_s22 = sld [smem:[#allocation20_spill]]  ;;  %24 = sbr.rel (!%p22_p2) target bundleno = 13 (0xd), region = 123 }
 0x144   : > { %s2463_s19 = smov %s2458_s15 }
 0x146   :  { %1196 = vsyncpa [#allocation3], 1 }
 0x147   :  { %1198 = vsyncpa [#allocation3 + $0x1], 1 }
 0x148   :  { %1199 = vsyncpa [#allocation6], 1 }
 0x149   :  { %1201 = vsyncpa [#allocation6 + $0x1], 1 }
 0x14a   :  { %1202 = vsyncpa [#allocation9], 1 }
 0x14b   :  { %1203 = vsyncpa [#allocation4], 1 }
 0x14c   :  { %1205 = vsyncpa [#allocation4 + $0x1], 1 }

</bundles_post_ra>
